<compile_context>
chip_gen: v7x
topology: tpu7x:2x2x1
jax: 0.10.0
libtpu: 0.0.40
codegen_flags: <defaults>
</compile_context>

<pallas_src>
import functools

import jax
import jax.numpy as jnp
from jax.experimental import pallas as pl
from jax.experimental.pallas import tpu as pltpu


def _log_softmax_rows(z):
    # numerically stable log_softmax along axis=1
    m = jnp.max(z, axis=1, keepdims=True)
    zs = z - m
    lse = jnp.log(jnp.sum(jnp.exp(zs), axis=1, keepdims=True))
    return zs - lse


def columnnet_kernel(n_relu, x_ref, w1_ref, b1_ref, wt_ref, bt_ref, out_ref):
    """Fused ColumnNet forward for one batch tile.

    n_relu: static int — lanes [0, n_relu) of the fused hidden layer get relu
            (column 1), lanes [n_relu, H) get sigmoid (column 2).
    """
    x = x_ref[...]                                                    # (TB, 16)

    # fused layer-1 of both columns: one MXU matmul, f32 accumulation
    h = jnp.dot(x, w1_ref[...], preferred_element_type=jnp.float32) + b1_ref[...]

    # per-column activation via lane select.
    # sigmoid(h) == 0.5*(tanh(h/2)+1): single EUP push per element (vs exp+recip).
    lane = jax.lax.broadcasted_iota(jnp.int32, h.shape, dimension=1)
    sig = 0.5 * (jnp.tanh(0.5 * h) + 1.0)
    h_act = jnp.where(lane < n_relu, jnp.maximum(h, 0.0), sig)

    # fused tail: blockdiag(w12, w22) @ wl pre-folded in the wrapper -> one matmul
    z = jnp.dot(h_act, wt_ref[...], preferred_element_type=jnp.float32) + bt_ref[...]
    z = jnp.maximum(z, 0.0)
    out_ref[...] = _log_softmax_rows(z).astype(out_ref.dtype)


def _pack_params(p, dtype=jnp.float32):
    """Trace-time algebraic fusion of the ColumnNet parameters (exact)."""
    n1 = p["w11"].shape[1]          # 32 (relu column hidden)
    n2 = p["w21"].shape[1]          # 24 (sigmoid column hidden)
    o1 = p["w12"].shape[1]          # 8
    o2 = p["w22"].shape[1]          # 8

    # fused first layer: (16, n1+n2)
    w1 = jnp.concatenate([p["w11"], p["w21"]], axis=1)
    b1 = jnp.concatenate([p["b11"], p["b21"]], axis=1)

    # fused tail: blockdiag(w12, w22) @ wl  -> (n1+n2, out_dim)
    bd = jnp.zeros((n1 + n2, o1 + o2), jnp.float32)
    bd = bd.at[:n1, :o1].set(p["w12"])
    bd = bd.at[n1:, o1:].set(p["w22"])
    wt = bd @ p["wl"]
    bt = jnp.concatenate([p["b12"], p["b22"]], axis=1) @ p["wl"] + p["bl"]
    return w1.astype(dtype), b1, wt.astype(dtype), bt, n1


def _tpu_budget():
    """Per-generation batch tile and scoped-VMEM limit.

    64-MiB-VMEM chips (v7x): TB=4096, limit=48 MiB.
    128-MiB-VMEM chips (v5e/v6e): TB=8192, limit=96 MiB.
    (~4 KB of VMEM per row for the lane-padded (TB,16)/(TB,56)/(TB,10) tiles,
    double-buffered I/O plus matmul/activation temporaries.)
    """
    vmem_phys = 64 << 20
    try:
        info = pltpu.get_tpu_info()
        vmem_phys = int(getattr(info, "vmem_capacity_bytes", vmem_phys))
    except Exception:
        pass
    tb = 8192 if vmem_phys >= (100 << 20) else 4096
    limit = min(96 << 20, (vmem_phys * 3) // 4)
    return tb, limit


def columnnet_forward(x, params, block_rows=None, use_bf16=False):
    """x: [B, 16] float32; params: dict of (in,out) weights and (1,out) biases."""
    feed_dtype = jnp.bfloat16 if use_bf16 else jnp.float32
    w1, b1, wt, bt, n_relu = _pack_params(params, dtype=feed_dtype)
    B, D = x.shape
    out_dim = wt.shape[1]
    x = x.astype(feed_dtype)

    tb_default, vmem_limit = _tpu_budget()
    tb = block_rows if block_rows is not None else tb_default
    tb = min(tb, B)                      # block must not exceed the array extent
    n_tiles = pl.cdiv(B, tb)             # ragged last block handled by the grid

    def resident(arr):
        # weights/biases: same (0,...) block every grid step -> stay VMEM-resident
        shape = arr.shape
        return pl.BlockSpec(shape, lambda i: (0,) * len(shape))

    bytes_per_elem = 2 if use_bf16 else 4
    cost = pl.CostEstimate(
        flops=2 * B * (D * w1.shape[1] + wt.shape[0] * out_dim),
        transcendentals=B * (w1.shape[1] + out_dim + 1),
        bytes_accessed=B * (D * bytes_per_elem + out_dim * 4)
        + (w1.size + wt.size) * bytes_per_elem + (b1.size + bt.size) * 4,
    )

    out = pl.pallas_call(
        functools.partial(columnnet_kernel, n_relu),
        out_shape=jax.ShapeDtypeStruct((B, out_dim), jnp.float32),
        grid_spec=pltpu.PrefetchScalarGridSpec(
            num_scalar_prefetch=0,
            grid=(n_tiles,),
            in_specs=[
                pl.BlockSpec((tb, D), lambda i: (i, 0)),
                resident(w1),
                resident(b1),
                resident(wt),
                resident(bt),
            ],
            out_specs=pl.BlockSpec((tb, out_dim), lambda i: (i, 0)),
        ),
        compiler_params=pltpu.CompilerParams(
            dimension_semantics=("parallel",),
            vmem_limit_bytes=int(vmem_limit),
        ),
        cost_estimate=cost,
    )(x, w1, b1, wt, bt)
    return out


def init_params(key):
    """Deterministic init matching ColumnNet(
        layer_sizes=[[16, 32, 8], [16, 24, 8]],
        activations=['relu', 'sigmoid'],
        last_layer=10)."""
    keys = jax.random.split(key, 10)

    def linear(kw, kb, fan_in, fan_out):
        bound = 1.0 / jnp.sqrt(fan_in)
        w = jax.random.uniform(kw, (fan_in, fan_out), jnp.float32, -bound, bound)
        b = jax.random.uniform(kb, (1, fan_out), jnp.float32, -bound, bound)
        return w, b

    p = {}
    p["w11"], p["b11"] = linear(keys[0], keys[1], 16, 32)
    p["w12"], p["b12"] = linear(keys[2], keys[3], 32, 8)
    p["w21"], p["b21"] = linear(keys[4], keys[5], 16, 24)
    p["w22"], p["b22"] = linear(keys[6], keys[7], 24, 8)
    p["wl"], p["bl"] = linear(keys[8], keys[9], 16, 10)   # catlayer_size = 8 + 8
    return p


def reference_forward(x, p):
    # unfused reference, matches the PyTorch module exactly
    h1 = jnp.maximum(x @ p["w11"] + p["b11"], 0.0)
    y1 = h1 @ p["w12"] + p["b12"]
    h2 = jax.nn.sigmoid(x @ p["w21"] + p["b21"])
    y2 = h2 @ p["w22"] + p["b22"]
    z = jnp.maximum(jnp.concatenate([y1, y2], axis=1) @ p["wl"] + p["bl"], 0.0)
    return jax.nn.log_softmax(z, axis=1)


if __name__ == "__main__":
    key = jax.random.PRNGKey(0)
    k_in, k_par, k_in2 = jax.random.split(key, 3)

    B, D_IN = 8, 16
    x = jax.random.normal(k_in, (B, D_IN), jnp.float32)
    params = init_params(k_par)

    out = jax.block_until_ready(columnnet_forward(x, params))
    ref = reference_forward(x, params)
    assert out.shape == (B, 10)
    # tail fold / tanh-sigmoid are mathematically exact; tolerance covers fp reassociation
    assert jnp.allclose(out, ref, atol=1e-4, rtol=1e-4), "mismatch vs reference"

    # exercise the multi-tile + ragged-last-block path (grid > 1, no jnp.pad)
    B2 = 520
    x2 = jax.random.normal(k_in2, (B2, D_IN), jnp.float32)
    out2 = jax.block_until_ready(columnnet_forward(x2, params, block_rows=256))
    ref2 = reference_forward(x2, params)
    assert out2.shape == (B2, 10)
    assert jnp.allclose(out2, ref2, atol=1e-4, rtol=1e-4), "mismatch (tiled) vs reference"

    print("KERNEL_OK")
</pallas_src>

<mosaic_0001>
module attributes {stable_mosaic.version = 11 : i64} {
  func.func @columnnet_kernel(%arg0: i32, %arg1: memref<8x16xf32, #tpu.memory_space<vmem>>, %arg2: memref<16x56xf32, #tpu.memory_space<vmem>>, %arg3: memref<1x56xf32, #tpu.memory_space<vmem>>, %arg4: memref<56x10xf32, #tpu.memory_space<vmem>>, %arg5: memref<1x10xf32, #tpu.memory_space<vmem>>, %arg6: memref<8x10xf32, #tpu.memory_space<vmem>>) attributes {dimension_semantics = [#tpu.dimension_semantics<parallel>], iteration_bounds = array<i64: 1>, scalar_prefetch = 0 : i64, scratch_operands = 0 : i64, tpu.core_type = #tpu.core_type<tc>, window_params = [{transform_indices = @transform_0, window_bounds = array<i64: 8, 16>}, {pipeline_mode = #tpu.pipeline_mode<synchronous>, transform_indices = @transform_1, window_bounds = array<i64: 16, 56>}, {pipeline_mode = #tpu.pipeline_mode<synchronous>, transform_indices = @transform_2, window_bounds = array<i64: 1, 56>}, {pipeline_mode = #tpu.pipeline_mode<synchronous>, transform_indices = @transform_3, window_bounds = array<i64: 56, 10>}, {pipeline_mode = #tpu.pipeline_mode<synchronous>, transform_indices = @transform_4, window_bounds = array<i64: 1, 10>}, {transform_indices = @transform_5, window_bounds = array<i64: 8, 10>}]} {
    %c0 = arith.constant 0 : index
    %c0_0 = arith.constant 0 : index
    %0 = vector.load %arg1[%c0, %c0_0] : memref<8x16xf32, #tpu.memory_space<vmem>>, vector<8x16xf32>
    %c0_1 = arith.constant 0 : index
    %c0_2 = arith.constant 0 : index
    %1 = vector.load %arg2[%c0_1, %c0_2] : memref<16x56xf32, #tpu.memory_space<vmem>>, vector<16x56xf32>
    %cst = arith.constant dense<0.000000e+00> : vector<8x56xf32>
    %2 = tpu.matmul %0, %1, %cst {dimension_numbers = #tpu.dot_dimension_numbers<[1], [0], [0], [1], [0, 0, 1, 1], [], []>} : vector<8x16xf32>, vector<16x56xf32>, vector<8x56xf32> -> vector<8x56xf32>
    %c0_3 = arith.constant 0 : index
    %c0_4 = arith.constant 0 : index
    %3 = vector.load %arg3[%c0_3, %c0_4] : memref<1x56xf32, #tpu.memory_space<vmem>>, vector<1x56xf32>
    %4 = vector.broadcast %3 : vector<1x56xf32> to vector<8x56xf32>
    %5 = arith.addf %2, %4 : vector<8x56xf32>
    %6 = tpu.iota {dimensions = array<i32: 1>} : vector<8x56xi32>
    %cst_5 = arith.constant 5.000000e-01 : f32
    %7 = vector.broadcast %cst_5 : f32 to vector<8x56xf32>
    %8 = arith.mulf %7, %5 : vector<8x56xf32>
    %9 = math.tanh %8 : vector<8x56xf32>
    %cst_6 = arith.constant 1.000000e+00 : f32
    %10 = vector.broadcast %cst_6 : f32 to vector<8x56xf32>
    %11 = arith.addf %9, %10 : vector<8x56xf32>
    %cst_7 = arith.constant 5.000000e-01 : f32
    %12 = vector.broadcast %cst_7 : f32 to vector<8x56xf32>
    %13 = arith.mulf %12, %11 : vector<8x56xf32>
    %c32_i32 = arith.constant 32 : i32
    %14 = vector.broadcast %c32_i32 : i32 to vector<8x56xi32>
    %15 = arith.cmpi slt, %6, %14 : vector<8x56xi32>
    %cst_8 = arith.constant 0.000000e+00 : f32
    %16 = vector.broadcast %cst_8 : f32 to vector<8x56xf32>
    %17 = arith.maximumf %5, %16 : vector<8x56xf32>
    %18 = arith.select %15, %17, %13 : vector<8x56xi1>, vector<8x56xf32>
    %c0_9 = arith.constant 0 : index
    %c0_10 = arith.constant 0 : index
    %19 = vector.load %arg4[%c0_9, %c0_10] : memref<56x10xf32, #tpu.memory_space<vmem>>, vector<56x10xf32>
    %cst_11 = arith.constant dense<0.000000e+00> : vector<8x10xf32>
    %20 = tpu.matmul %18, %19, %cst_11 {dimension_numbers = #tpu.dot_dimension_numbers<[1], [0], [0], [1], [0, 0, 1, 1], [], []>} : vector<8x56xf32>, vector<56x10xf32>, vector<8x10xf32> -> vector<8x10xf32>
    %c0_12 = arith.constant 0 : index
    %c0_13 = arith.constant 0 : index
    %21 = vector.load %arg5[%c0_12, %c0_13] : memref<1x10xf32, #tpu.memory_space<vmem>>, vector<1x10xf32>
    %22 = vector.broadcast %21 : vector<1x10xf32> to vector<8x10xf32>
    %23 = arith.addf %20, %22 : vector<8x10xf32>
    %cst_14 = arith.constant 0.000000e+00 : f32
    %24 = vector.broadcast %cst_14 : f32 to vector<8x10xf32>
    %25 = arith.maximumf %23, %24 : vector<8x10xf32>
    %cst_15 = arith.constant dense<0xFF800000> : vector<8xf32>
    %26 = vector.multi_reduction <maximumf>, %25, %cst_15 [1] : vector<8x10xf32> to vector<8xf32>
    %27 = vector.shape_cast %26 : vector<8xf32> to vector<8x1xf32>
    %28 = vector.broadcast %27 : vector<8x1xf32> to vector<8x10xf32>
    %29 = arith.subf %25, %28 : vector<8x10xf32>
    %30 = math.exp %29 : vector<8x10xf32>
    %cst_16 = arith.constant dense<0.000000e+00> : vector<8xf32>
    %31 = vector.multi_reduction <add>, %30, %cst_16 [1] : vector<8x10xf32> to vector<8xf32>
    %32 = vector.shape_cast %31 : vector<8xf32> to vector<8x1xf32>
    %33 = math.log %32 : vector<8x1xf32>
    %34 = vector.broadcast %33 : vector<8x1xf32> to vector<8x10xf32>
    %35 = arith.subf %29, %34 : vector<8x10xf32>
    %c0_17 = arith.constant 0 : index
    %c0_18 = arith.constant 0 : index
    %36 = vector.load %arg6[%c0_17, %c0_18] : memref<8x10xf32, #tpu.memory_space<vmem>>, vector<8x10xf32>
    tpu.vector_store %arg6[%c0_17, %c0_18], %35 {strides = array<i32>} : memref<8x10xf32, #tpu.memory_space<vmem>>, vector<8x10xf32>,
    return
  }
  func.func @transform_0(%arg0: i32) -> (i32, i32) {
    %c0_i32 = arith.constant 0 : i32
    %c0_i32_0 = arith.constant 0 : i32
    return %arg0, %c0_i32 : i32, i32
  }
  func.func @transform_1(%arg0: i32) -> (i32, i32) {
    %c0_i32 = arith.constant 0 : i32
    %c0_i32_0 = arith.constant 0 : i32
    %c0_i32_1 = arith.constant 0 : i32
    return %c0_i32, %c0_i32_0 : i32, i32
  }
  func.func @transform_2(%arg0: i32) -> (i32, i32) {
    %c0_i32 = arith.constant 0 : i32
    %c0_i32_0 = arith.constant 0 : i32
    %c0_i32_1 = arith.constant 0 : i32
    return %c0_i32, %c0_i32_0 : i32, i32
  }
  func.func @transform_3(%arg0: i32) -> (i32, i32) {
    %c0_i32 = arith.constant 0 : i32
    %c0_i32_0 = arith.constant 0 : i32
    %c0_i32_1 = arith.constant 0 : i32
    return %c0_i32, %c0_i32_0 : i32, i32
  }
  func.func @transform_4(%arg0: i32) -> (i32, i32) {
    %c0_i32 = arith.constant 0 : i32
    %c0_i32_0 = arith.constant 0 : i32
    %c0_i32_1 = arith.constant 0 : i32
    return %c0_i32, %c0_i32_0 : i32, i32
  }
  func.func @transform_5(%arg0: i32) -> (i32, i32) {
    %c0_i32 = arith.constant 0 : i32
    %c0_i32_0 = arith.constant 0 : i32
    return %arg0, %c0_i32 : i32, i32
  }
}

</mosaic_0001>

<bundles_post_ra>
// kernel: tpu_custom_call.1
= control target key start
LH: loop header
LB: loop body
LE: loop exit
PB: predicated region body
PF: predicated region fallthrough
CT: control target
= control target key end

     0   :  { %v316_v2 = vmov 0.0|0.0   ;;  %vm317_vm0 = vmmov 0   ;;  %v318_v4 = vmov 0.0   ;;  %s401_s0 = inlined_call_operand.vmem [shape: f32[8,16], index: 0, kind: input, shape index: {}]   ;;  %s402_s1 = inlined_call_operand.vmem [shape: f32[16,56], index: 1, kind: input, shape index: {}]   ;;  %s403_s2 = inlined_call_operand.vmem [shape: f32[1,56], index: 2, kind: input, shape index: {}]   ;;  %s404_s3 = inlined_call_operand.vmem [shape: f32[56,10], index: 3, kind: input, shape index: {}]   ;;  %s405_s4 = inlined_call_operand.vmem [shape: f32[1,10], index: 4, kind: input, shape index: {}]   ;;  %s406_s5 = inlined_call_operand.hbm [shape: f32[8,10], index: 5, kind: output, shape index: {}]  }
   0x1   :  { %v22_v0 = vld [vmem:[%s402_s1] sm:$0xff]  ;;  %v23_v1 = vld [vmem:[%s402_s1 + $0x8] sm:$0xff]  ;;  %270 = vmatprep.subr.bf16.mxu0 %v316_v2  ;;  %250 = vmatprep.mubr.msk.f32.mxu0 %vm317_vm0, %v318_v4 }
   0x2   :  { %v271_v3 = vpack.c.bf16 %v23_v1, %v22_v0 }
   0x3   :  { %10 = vsyncpa [#allocation3], 0  ;;  %273 = vmatprep.subr.bf16.mxu1 %v316_v2  ;;  %267 = vmatprep.mubr.msk.f32.mxu1 %vm317_vm0, %v318_v4  ;;  %v21_v5 = vld [vmem:[%s401_s0] sm:$0xff]  ;;  %vm31_vm1 = vcmask 130048   ;;  %v115_v7 = vld [vmem:[%s404_s3 + $0x8] sm:$0xff]  ;;  %v105_v21 = vlaneseq  ;;  %vm128_vm3 = vcmask 457728  }
   0x4   :  { %272 = vmatpush3.bf16.msra.mxu0 %v271_v3  ;;  %v114_v6 = vld [vmem:[%s404_s3] sm:$0xff]  ;;  %v116_v9 = vld [vmem:[%s404_s3 + $0x10] sm:$0xff]  ;;  %v117_v10 = vld [vmem:[%s404_s3 + $0x18] sm:$0xff]  ;;  %vm203_vm4 = vcmask 80896  }
   0x5   :  { %v274_v8 = vpack.c.bf16 %v115_v7, %v114_v6  ;;  %v277_v11 = vpack.c.bf16 %v117_v10, %v116_v9  ;;  %v118_v12 = vld [vmem:[%s404_s3 + $0x20] sm:$0xff]  ;;  %v119_v13 = vld [vmem:[%s404_s3 + $0x28] sm:$0xff]  ;;  %v120_v15 = vld [vmem:[%s404_s3 + $0x30] sm:$0xff]  ;;  %v106_v22 = vand.u32 127, %v105_v21 }
   0x6   :  { %v280_v14 = vpack.c.bf16 %v119_v13, %v118_v12  ;;  %v231_v16 = vld [vmem:[%s403_s2] ss:$0 sm:$0xff]  ;;  %s319_s2 = smov [#allocation2]  }
   0x7   :  { %251 = vmatmul.mubr.msk.f32.vlgmr.msra.gmra.mrb[0].mxu0 %vm31_vm1, %v21_v5  ;;  %275 = vmatpush3.bf16.msra.mxu1 %v274_v8  ;;  %vm111_vm2 = vcmp.lt.s32.totalorder %v106_v22, 32  ;;  %v233_v28 = vld [vmem:[%s405_s4] ss:$0 sm:$0xff]  ;;  %s223_s4 = sshll.u32 %s319_s2, 4  ;;  %s224_s4 = int_to_ptr.vmem [resolvable:$true] %s223_s4 }
   0x8   :  { %276 = vmatprep.subr.bf16.mxu1 %v316_v2  ;;  %s292_s14 = scalar_lea.vmem %s224_s4, 128  ;;  %p297_p1 = scmp.lt.s32.totalorder %s224_s4, %s224_s4 }
   0x9   :  { %p293_p0 = scmp.ne.s32.totalorder %s224_s4, %s292_s14  ;;  %p298_p2 = scmp.lt.s32.totalorder %s292_s14, %s292_s14 }
   0xb   :  { %278 = vmatpush3.bf16.msra.mxu1 %v277_v11  ;;  %p299_p3 = por %p298_p2, %p297_p1 }
   0xc   :  { %279 = vmatprep.subr.bf16.mxu1 %v316_v2 }
   0xd   :  { %p300_p4 = pnand %p299_p3, %p293_p0 }
   0xf   :  { %281 = vmatpush3.bf16.msra.mxu1 %v280_v14 }
  0x10   :  { %265 = vmatprep.subr.mxu1 %v318_v4 }
  0x13   :  { %266 = vmatpush3.msra.mxu1 %v120_v15 }
  0xda   :  { %v101_v17 = vpop.f32.mrb[0].mxu0 }
  0xdb   :  { %v102_v18 = vadd.f32 %v231_v16, %v101_v17  ;;  %v252_v19 = vpop.f32.mrb[1].mxu0 }
  0xdd   :  { %v107_v20 = vmul.f32 0.5, %v102_v18  ;;  %v112_v26 = vmax.f32 %v102_v18, 0.0 }
  0xdf   :  { %286 = vtanh.f32 %v107_v20 }
  0xe9   :  { %v287_v23 = vpop.eup %286 }
  0xea   :  { %v109_v24 = vadd.f32 1.0, %v287_v23 }
  0xec   :  { %v110_v25 = vmul.f32 0.5, %v109_v24 }
  0xee   :  { %v113_v27 = vsel %vm111_vm2, %v112_v26, %v110_v25 }
  0xef   :  { %268 = vmatmul.mubr.msk.f32.vlgmr.msra.gmra.mrb[0].mxu1 %vm128_vm3, %v113_v27 }
 0x1c2   :  { %v198_v29 = vpop.f32.mrb[0].mxu1 }
 0x1c3   :  { %v199_v30 = vadd.f32 %v233_v28, %v198_v29  ;;  %v269_v31 = vpop.f32.mrb[1].mxu1 }
 0x1c5   :  { %v202_v32 = vmax.f32 %v199_v30, 0.0 }
 0x1c7   :  { %v204_v33 = vsel %vm203_vm4, %v202_v32, -inf }
 0x1c8   :  { %205 = vmax.xlane.f32.xlu0 %v204_v33 }
 0x255   :  { %v206_v34 = vpop.xlane.xlu0 %205 }
 0x256   :  { %v207_v35 = vsub.f32 %v202_v32, %v206_v34 }
 0x258   :  { %v208_v36 = vmul.f32 1.442695, %v207_v35 }
 0x25a   :  { %288 = vpow2.f32 %v208_v36 }
 0x264   :  { %v289_v37 = vpop.eup %288 }
 0x265   :  { %v210_v38 = vsel %vm203_vm4, %v289_v37, 0.0 }
 0x266   :  { %211 = vadd.xlane.f32.xlu0 %v210_v38 }
 0x2f3   :  { %v212_v39 = vpop.xlane.xlu0 %211 }
 0x2f4   :  { %290 = vlog2.f32 %v212_v39 }
 0x2fe   :  { %v291_v40 = vpop.eup %290 }
 0x2ff   :  { %v214_v41 = vmul.f32 0.6931472, %v291_v40 }
 0x301   :  { %v215_v42 = vsub.f32 %v207_v35, %v214_v41 }
 0x303   :  { %216 = vst.msk [vmem:[#allocation2] sm:$0xff] %vm203_vm4, %v215_v42 }
 0x304   :  { %303 = shalt.err (!%p300_p4)
}
 0x305   :  { %s304_s17 = scalar_lea.hbm %s406_s5, 128 }
 0x306   :  { %p305_p5 = scmp.ne.s32.totalorder %s406_s5, %s304_s17  ;;  %p308_p6 = scmp.lt.u32.totalorder %s304_s17, %s406_s5 }
 0x308   :  { %p310_p7 = pnand %p308_p6, %p305_p5 }
 0x30a   :  { %313 = shalt.err (!%p310_p7)
}
 0x30b   :  { %226 = dma.vmem_to_hbm [thread:$0]  %s224_s4, 128, %s406_s5, [#allocation3]  }
 0x30c   :  { %314 = dma.done.wait [#allocation3], 128  }
 0x30d   :  { %315 = vsyncadd [#allocation3], 4294967168 }
 0x30e   :  { %230 = vsyncpa [#allocation3], 1 }

</bundles_post_ra>
